<compile_context>
chip_gen: v7x
topology: tpu7x:2x2x1
jax: 0.10.0
libtpu: 0.0.40
codegen_flags: <defaults>
</compile_context>

<pallas_src>
import functools

import jax
import jax.numpy as jnp
from jax.experimental import pallas as pl
from jax.experimental.pallas import tpu as pltpu

EPS = 1e-9
LANES = 128
MAX_TILE_ROWS = 8192            # 8192 * 128 * 4 B = 4 MiB per f32 input block


def _cdiv(a: int, b: int) -> int:
    return (a + b - 1) // b


def _round_up(a: int, b: int) -> int:
    return _cdiv(a, b) * b


def _sublane_granule(itemsize: int) -> int:
    # 8 rows per 32-bit sublane tile; sub-32-bit dtypes pack 2x/4x along sublanes.
    return 8 * max(1, 4 // max(1, itemsize))


def _dice_partial_kernel(x_ref, t_ref, out_ref, *, tile_rows, rows, ragged):
    """Accumulate (sum(p*t), sum(p+t)) into a resident (2, 8, LANES) output."""
    j = pl.program_id(0)

    @pl.when(j == 0)
    def _init():
        out_ref[...] = jnp.zeros_like(out_ref)

    p = jax.nn.sigmoid(x_ref[...].astype(jnp.float32))
    t = t_ref[...].astype(jnp.float32)

    groups = tile_rows // 8

    def _partial(v):
        # (tile_rows, LANES) -> (8, LANES): vreg-wise adds only, no cross-lane work.
        return jnp.sum(v.reshape(groups, 8, LANES), axis=0)

    def _accumulate(pv, tv):
        out_ref[0] += _partial(pv * tv)    # sum(p * t)
        out_ref[1] += _partial(pv + tv)    # sum(p) + sum(t)

    if not ragged:
        # Every block is fully valid: no masking work at all.
        _accumulate(p, t)
    else:
        last = pl.num_programs(0) - 1

        @pl.when(j < last)
        def _full():
            _accumulate(p, t)

        @pl.when(j == last)
        def _tail():
            # Only rows beyond `rows` are invalid (lanes are always full since
            # the wrapper passes a 128-aligned prefix).  Mask BEFORE the
            # multiply/add so stale VMEM contents cannot poison the sums.
            row = (j * tile_rows
                   + jax.lax.broadcasted_iota(jnp.int32, (tile_rows, LANES), 0))
            valid = row < rows
            _accumulate(jnp.where(valid, p, 0.0), jnp.where(valid, t, 0.0))


def dice_loss(logits: jax.Array, targets: jax.Array, eps: float = EPS) -> jax.Array:
    assert logits.shape == targets.shape
    n = int(logits.size)

    # Flatten in native dtype (kernel upcasts per block).
    flat_x = logits.reshape(-1)
    flat_t = targets.reshape(-1)

    n_main = (n // LANES) * LANES      # lane-aligned prefix handled by the kernel
    tail = n - n_main                  # <128 ragged elements handled in the wrapper

    pt_sum = jnp.float32(0.0)
    union_sum = jnp.float32(0.0)

    if n_main > 0:
        rows = n_main // LANES
        granule = max(_sublane_granule(flat_x.dtype.itemsize),
                      _sublane_granule(flat_t.dtype.itemsize))
        tile_rows = min(MAX_TILE_ROWS, _round_up(rows, granule))
        num_blocks = _cdiv(rows, tile_rows)
        ragged = (rows % tile_rows) != 0

        x_main = flat_x if tail == 0 else flat_x[:n_main]
        t_main = flat_t if tail == 0 else flat_t[:n_main]
        x2d = x_main.reshape(rows, LANES)
        t2d = t_main.reshape(rows, LANES)

        in_itembytes = x2d.dtype.itemsize + t2d.dtype.itemsize
        # Double-buffered input blocks + small output/scratch slack; at least
        # 32 MiB so the 8192-row tile also fits v5e's 16 MiB scoped default.
        vmem_limit = max(2 * tile_rows * LANES * in_itembytes + (2 << 20), 32 << 20)

        cost = pl.CostEstimate(
            flops=5 * n_main,
            transcendentals=n_main,
            bytes_accessed=n_main * in_itembytes + 2 * 8 * LANES * 4,
        )

        kernel = functools.partial(
            _dice_partial_kernel, tile_rows=tile_rows, rows=rows, ragged=ragged)

        partial = pl.pallas_call(
            kernel,
            out_shape=jax.ShapeDtypeStruct((2, 8, LANES), jnp.float32),
            grid_spec=pltpu.PrefetchScalarGridSpec(
                num_scalar_prefetch=0,
                grid=(num_blocks,),
                in_specs=[
                    pl.BlockSpec((tile_rows, LANES), lambda j: (j, 0)),
                    pl.BlockSpec((tile_rows, LANES), lambda j: (j, 0)),
                ],
                # Constant block index across the reduction axis -> output stays
                # resident in VMEM and acts as the accumulator.
                out_specs=pl.BlockSpec((2, 8, LANES), lambda j: (0, 0, 0)),
            ),
            compiler_params=pltpu.CompilerParams(
                dimension_semantics=("arbitrary",),
                vmem_limit_bytes=int(vmem_limit),
            ),
            cost_estimate=cost,
        )(x2d, t2d)

        sums = jnp.sum(partial, axis=(1, 2))       # (2,): sum(p*t), sum(p)+sum(t)
        pt_sum = sums[0]
        union_sum = sums[1]

    if tail > 0:
        xt = jax.nn.sigmoid(flat_x[n_main:].astype(jnp.float32))
        tt = flat_t[n_main:].astype(jnp.float32)
        pt_sum = pt_sum + jnp.sum(xt * tt)
        union_sum = union_sum + jnp.sum(xt) + jnp.sum(tt)

    intersection = 2.0 * pt_sum
    # Matches the PyTorch module: eps only in the numerator.
    return 1.0 - (intersection + eps) / union_sum


def _reference_dice_loss(logits, targets, eps=EPS):
    p = jax.nn.sigmoid(logits.astype(jnp.float32)).reshape(logits.shape[0], -1)
    t = targets.astype(jnp.float32).reshape(targets.shape[0], -1)
    intersection = 2.0 * jnp.sum(p * t)
    union = jnp.sum(p) + jnp.sum(t)
    return 1.0 - (intersection + eps) / union


if __name__ == "__main__":
    key = jax.random.PRNGKey(0)
    k_logits, k_targets = jax.random.split(key)

    # Small segmentation-style input: (B, C, H, W).
    shape = (2, 4, 16, 16)
    logits = jax.random.normal(k_logits, shape, dtype=jnp.float32)
    targets = (jax.random.uniform(k_targets, shape) > 0.5).astype(jnp.float32)

    loss = dice_loss(logits, targets)
    jax.block_until_ready(loss)

    ref = _reference_dice_loss(logits, targets)
    assert jnp.allclose(loss, ref, atol=1e-5, rtol=1e-5), (loss, ref)

    print("KERNEL_OK")
</pallas_src>

<mosaic_0001>
module attributes {stable_mosaic.version = 11 : i64} {
  func.func @_dice_partial_kernel(%arg0: i32, %arg1: memref<16x128xf32, #tpu.memory_space<vmem>>, %arg2: memref<16x128xf32, #tpu.memory_space<vmem>>, %arg3: memref<2x8x128xf32, #tpu.memory_space<vmem>>) attributes {dimension_semantics = [#tpu.dimension_semantics<arbitrary>], iteration_bounds = array<i64: 1>, scalar_prefetch = 0 : i64, scratch_operands = 0 : i64, tpu.core_type = #tpu.core_type<tc>, window_params = [{transform_indices = @transform_0, window_bounds = array<i64: 16, 128>}, {transform_indices = @transform_1, window_bounds = array<i64: 16, 128>}, {pipeline_mode = #tpu.pipeline_mode<synchronous>, transform_indices = @transform_2, window_bounds = array<i64: 2, 8, 128>}]} {
    %c0_i32 = arith.constant 0 : i32
    %0 = arith.cmpi eq, %arg0, %c0_i32 : i32
    %1 = arith.extui %0 : i1 to i32
    %c0_i32_0 = arith.constant 0 : i32
    %2 = arith.cmpi ne, %1, %c0_i32_0 : i32
    scf.if %2 {
      %cst_17 = arith.constant 0.000000e+00 : f32
      %28 = vector.broadcast %cst_17 : f32 to vector<2x8x128xf32>
      %c0_18 = arith.constant 0 : index
      %c0_19 = arith.constant 0 : index
      %c0_20 = arith.constant 0 : index
      %29 = vector.load %arg3[%c0_18, %c0_19, %c0_20] : memref<2x8x128xf32, #tpu.memory_space<vmem>>, vector<2x8x128xf32>
      tpu.vector_store %arg3[%c0_18, %c0_19, %c0_20], %28 {strides = array<i32>} : memref<2x8x128xf32, #tpu.memory_space<vmem>>, vector<2x8x128xf32>,
    } else {
    }
    %c0 = arith.constant 0 : index
    %c0_1 = arith.constant 0 : index
    %3 = vector.load %arg1[%c0, %c0_1] : memref<16x128xf32, #tpu.memory_space<vmem>>, vector<16x128xf32>
    %4 = arith.negf %3 : vector<16x128xf32>
    %5 = math.exp %4 : vector<16x128xf32>
    %cst = arith.constant 1.000000e+00 : f32
    %6 = vector.broadcast %cst : f32 to vector<16x128xf32>
    %7 = arith.addf %6, %5 : vector<16x128xf32>
    %8 = arith.divf %6, %7 : vector<16x128xf32>
    %c0_2 = arith.constant 0 : index
    %c0_3 = arith.constant 0 : index
    %9 = vector.load %arg2[%c0_2, %c0_3] : memref<16x128xf32, #tpu.memory_space<vmem>>, vector<16x128xf32>
    %c0_4 = arith.constant 0 : index
    %c0_5 = arith.constant 0 : index
    %c0_6 = arith.constant 0 : index
    %10 = vector.load %arg3[%c0_4, %c0_5, %c0_6] : memref<2x8x128xf32, #tpu.memory_space<vmem>>, vector<1x8x128xf32>
    %11 = vector.shape_cast %10 : vector<1x8x128xf32> to vector<8x128xf32>
    %12 = arith.mulf %8, %9 : vector<16x128xf32>
    %13 = vector.shape_cast %12 : vector<16x128xf32> to vector<2x8x128xf32>
    %cst_7 = arith.constant dense<0.000000e+00> : vector<8x128xf32>
    %14 = vector.multi_reduction <add>, %13, %cst_7 [0] : vector<2x8x128xf32> to vector<8x128xf32>
    %15 = arith.addf %11, %14 : vector<8x128xf32>
    %c0_8 = arith.constant 0 : index
    %c0_9 = arith.constant 0 : index
    %c0_10 = arith.constant 0 : index
    %16 = vector.load %arg3[%c0_8, %c0_9, %c0_10] : memref<2x8x128xf32, #tpu.memory_space<vmem>>, vector<1x8x128xf32>
    %17 = vector.shape_cast %16 : vector<1x8x128xf32> to vector<8x128xf32>
    %18 = vector.shape_cast %15 : vector<8x128xf32> to vector<1x8x128xf32>
    tpu.vector_store %arg3[%c0_8, %c0_9, %c0_10], %18 {strides = array<i32>} : memref<2x8x128xf32, #tpu.memory_space<vmem>>, vector<1x8x128xf32>,
    %c1 = arith.constant 1 : index
    %c0_11 = arith.constant 0 : index
    %c0_12 = arith.constant 0 : index
    %19 = vector.load %arg3[%c1, %c0_11, %c0_12] : memref<2x8x128xf32, #tpu.memory_space<vmem>>, vector<1x8x128xf32>
    %20 = vector.shape_cast %19 : vector<1x8x128xf32> to vector<8x128xf32>
    %21 = arith.addf %8, %9 : vector<16x128xf32>
    %22 = vector.shape_cast %21 : vector<16x128xf32> to vector<2x8x128xf32>
    %cst_13 = arith.constant dense<0.000000e+00> : vector<8x128xf32>
    %23 = vector.multi_reduction <add>, %22, %cst_13 [0] : vector<2x8x128xf32> to vector<8x128xf32>
    %24 = arith.addf %20, %23 : vector<8x128xf32>
    %c1_14 = arith.constant 1 : index
    %c0_15 = arith.constant 0 : index
    %c0_16 = arith.constant 0 : index
    %25 = vector.load %arg3[%c1_14, %c0_15, %c0_16] : memref<2x8x128xf32, #tpu.memory_space<vmem>>, vector<1x8x128xf32>
    %26 = vector.shape_cast %25 : vector<1x8x128xf32> to vector<8x128xf32>
    %27 = vector.shape_cast %24 : vector<8x128xf32> to vector<1x8x128xf32>
    tpu.vector_store %arg3[%c1_14, %c0_15, %c0_16], %27 {strides = array<i32>} : memref<2x8x128xf32, #tpu.memory_space<vmem>>, vector<1x8x128xf32>,
    return
  }
  func.func @transform_0(%arg0: i32) -> (i32, i32) {
    %c0_i32 = arith.constant 0 : i32
    %c0_i32_0 = arith.constant 0 : i32
    return %arg0, %c0_i32 : i32, i32
  }
  func.func @transform_1(%arg0: i32) -> (i32, i32) {
    %c0_i32 = arith.constant 0 : i32
    %c0_i32_0 = arith.constant 0 : i32
    return %arg0, %c0_i32 : i32, i32
  }
  func.func @transform_2(%arg0: i32) -> (i32, i32, i32) {
    %c0_i32 = arith.constant 0 : i32
    %c0_i32_0 = arith.constant 0 : i32
    %c0_i32_1 = arith.constant 0 : i32
    %c0_i32_2 = arith.constant 0 : i32
    return %c0_i32, %c0_i32_0, %c0_i32_1 : i32, i32, i32
  }
}

</mosaic_0001>

<bundles_post_ra>
// kernel: tpu_custom_call.1
= control target key start
LH: loop header
LB: loop body
LE: loop exit
PB: predicated region body
PF: predicated region fallthrough
CT: control target
= control target key end

     0   :  { %7 = vsyncpa [#allocation3], 0  ;;  %s246_s0 = inlined_call_operand.hbm [shape: f32[16,128], index: 0, kind: input, shape index: {}]   ;;  %s247_s1 = inlined_call_operand.hbm [shape: f32[16,128], index: 1, kind: input, shape index: {}]   ;;  %s248_s2 = inlined_call_operand.hbm [shape: f32[2,8,128], index: 2, kind: output, shape index: {}]  }
   0x1   :  { %8 = vsyncpa [#allocation6], 0 }
   0x2   :  { %9 = vsyncpa [#allocation4], 0  ;;  %s181_s9 = smov [#allocation2]   ;;  %s109_s13 = scalar_lea.hbm %s246_s0, 256 }
   0x3   :  { %s15_s10 = sshll.u32 %s181_s9, 4  ;;  %p110_p0 = scmp.ne.s32.totalorder %s246_s0, %s109_s13  ;;  %s16_s10 = int_to_ptr.vmem [resolvable:$true] %s15_s10 }
   0x4   :  { %p113_p1 = scmp.lt.u32.totalorder %s109_s13, %s246_s0 }
   0x6   :  { %p115_p2 = pnand %p113_p1, %p110_p0 }
   0x8   :  { %118 = shalt.err (!%p115_p2)
}
   0x9   :  { %s119_s18 = scalar_lea.vmem %s16_s10, 256  ;;  %p124_p4 = scmp.lt.s32.totalorder %s16_s10, %s16_s10 }
   0xa   :  { %p120_p3 = scmp.ne.s32.totalorder %s16_s10, %s119_s18  ;;  %p125_p5 = scmp.lt.s32.totalorder %s119_s18, %s119_s18 }
   0xc   :  { %p126_p6 = por %p125_p5, %p124_p4 }
   0xe   :  { %p127_p7 = pnand %p126_p6, %p120_p3 }
  0x10   :  { %130 = shalt.err (!%p127_p7)
}
  0x11   :  { %s182_s19 = smov 128   ;;  %s183_s20 = smov 8  }
  0x12   :  { %21 = dma.hbm_to_vmem [thread:$0]  %s246_s0, 256, %s16_s10, [#allocation3], %s182_s19, %s182_s19, %s183_s20  }
  0x13   :  { %s184_s23 = smov [#allocation5]   ;;  %s131_s27 = scalar_lea.hbm %s247_s1, 256 }
  0x14   :  { %s27_s24 = sshll.u32 %s184_s23, 4  ;;  %p132_p8 = scmp.ne.s32.totalorder %s247_s1, %s131_s27  ;;  %s28_s24 = int_to_ptr.vmem [resolvable:$true] %s27_s24 }
  0x15   :  { %p135_p9 = scmp.lt.u32.totalorder %s131_s27, %s247_s1 }
  0x17   :  { %p137_p10 = pnand %p135_p9, %p132_p8 }
  0x19   :  { %140 = shalt.err (!%p137_p10)
}
  0x1a   :  { %s141_s4 = scalar_lea.vmem %s28_s24, 256  ;;  %p146_p12 = scmp.lt.s32.totalorder %s28_s24, %s28_s24 }
  0x1b   :  { %p142_p11 = scmp.ne.s32.totalorder %s28_s24, %s141_s4  ;;  %p147_p13 = scmp.lt.s32.totalorder %s141_s4, %s141_s4 }
  0x1d   :  { %p148_p0 = por %p147_p13, %p146_p12 }
  0x1f   :  { %p149_p1 = pnand %p148_p0, %p142_p11 }
  0x21   :  { %152 = shalt.err (!%p149_p1)
}
  0x22   :  { %33 = dma.hbm_to_vmem [thread:$0]  %s247_s1, 256, %s28_s24, [#allocation6], %s182_s19, %s182_s19, %s183_s20  }
  0x23   :  { %175 = dma.done.wait [#allocation3], 256  }
  0x24   :  { %176 = vsyncadd [#allocation3], 4294967040 }
  0x25   :  { %177 = dma.done.wait [#allocation6], 256  }
  0x26   :  { %178 = vsyncadd [#allocation6], 4294967040  ;;  %v46_v0 = vld [vmem:[#allocation2] sm:$0xff]  ;;  %v47_v1 = vld [vmem:[#allocation2 + $0x8] sm:$0xff]  ;;  %s185_s1 = smov [#allocation7]  }
  0x27   :  { %v93_v2 = vmul.f32 -1.442695, %v46_v0  ;;  %v94_v3 = vmul.f32 -1.442695, %v47_v1  ;;  %v60_v8 = vld [vmem:[#allocation5] sm:$0xff]  ;;  %v61_v9 = vld [vmem:[#allocation5 + $0x8] sm:$0xff] }
  0x28   :  { %s80_s6 = sshll.u32 %s185_s1, 4  ;;  %s81_s6 = int_to_ptr.vmem [resolvable:$true] %s80_s6 }
  0x29   :  { %101 = vpow2.f32 %v93_v2  ;;  %s153_s7 = scalar_lea.vmem %s81_s6, 256  ;;  %p158_p3 = scmp.lt.s32.totalorder %s81_s6, %s81_s6 }
  0x2a   :  { %103 = vpow2.f32 %v94_v3  ;;  %p154_p2 = scmp.ne.s32.totalorder %s81_s6, %s153_s7  ;;  %p159_p4 = scmp.lt.s32.totalorder %s153_s7, %s153_s7 }
  0x2c   :  { %p160_p5 = por %p159_p4, %p158_p3 }
  0x2e   :  { %p161_p6 = pnand %p160_p5, %p154_p2 }
  0x33   :  { %v102_v4 = vpop.eup %101 }
  0x34   :  { %v104_v5 = vpop.eup %103  ;;  %v54_v6 = vadd.f32 1.0, %v102_v4 }
  0x35   :  { %v55_v7 = vadd.f32 1.0, %v104_v5 }
  0x36   :  { %105 = vrcp.f32 %v54_v6 }
  0x37   :  { %107 = vrcp.f32 %v55_v7 }
  0x40   :  { %v106_v10 = vpop.eup %105 }
  0x41   :  { %v108_v11 = vpop.eup %107  ;;  %v63_v12 = vmul.f32 %v106_v10, %v60_v8  ;;  %v70_v13 = vadd.f32 %v106_v10, %v60_v8 }
  0x42   :  { %v64_v14 = vmul.f32 %v108_v11, %v61_v9  ;;  %v71_v15 = vadd.f32 %v108_v11, %v61_v9 }
  0x44   :  { %v65_v16 = vadd.f32 %v64_v14, %v63_v12  ;;  %v72_v17 = vadd.f32 %v71_v15, %v70_v13 }
  0x46   :  { %67 = vst [vmem:[#allocation7] sm:$0xff] %v65_v16  ;;  %74 = vst [vmem:[#allocation7 + $0x8] sm:$0xff] %v72_v17 }
  0x47   :  { %164 = shalt.err (!%p161_p6)
}
  0x48   :  { %s165_s10 = scalar_lea.hbm %s248_s2, 256 }
  0x49   :  { %p166_p7 = scmp.ne.s32.totalorder %s248_s2, %s165_s10  ;;  %p169_p8 = scmp.lt.u32.totalorder %s165_s10, %s248_s2 }
  0x4b   :  { %p171_p9 = pnand %p169_p8, %p166_p7 }
  0x4d   :  { %174 = shalt.err (!%p171_p9)
}
  0x4e   :  { %86 = dma.vmem_to_hbm [thread:$0]  %s81_s6, 256, %s248_s2, [#allocation4], %s182_s19, %s182_s19, %s183_s20  }
  0x4f   :  { %179 = dma.done.wait [#allocation4], 256  }
  0x50   :  { %180 = vsyncadd [#allocation4], 4294967040 }
  0x51   :  { %90 = vsyncpa [#allocation3], 1 }
  0x52   :  { %91 = vsyncpa [#allocation6], 1 }
  0x53   :  { %92 = vsyncpa [#allocation4], 1 }

</bundles_post_ra>
